<compile_context>
chip_gen: v6e
topology: v6e:2x2x1
jax: 0.10.0
libtpu: 0.0.40
codegen_flags: <defaults>
</compile_context>

<pallas_src>
import functools

import jax
import jax.numpy as jnp
from jax.experimental import pallas as pl
from jax.experimental.pallas import tpu as pltpu


# ---------------------------------------------------------------------------
# Helpers
# ---------------------------------------------------------------------------
def _round_up(n, m):
    return ((n + m - 1) // m) * m


def _pad_to(x, shape):
    return jnp.pad(x, [(0, s - d) for d, s in zip(x.shape, shape)])


def _pack_layer(w, b, kp, np_, dtype):
    """Pack an (in, out) weight and its bias into one (kp + 8, np_) slab.

    Rows [0, kp): zero-padded weight.  Row kp: bias.  Rows kp+1..kp+7: zero.
    """
    w_p = _pad_to(w.astype(jnp.float32), (kp, np_))
    b_p = _pad_to(b.astype(jnp.float32).reshape(1, -1), (8, np_))
    return jnp.concatenate([w_p, b_p], axis=0).astype(dtype)


def prepare_actor_params(params, weight_dtype=jnp.bfloat16):
    """One-time padding / packing / casting of the Actor parameters.

    Weights are stored pre-transposed as (in, out).  Call this ONCE outside
    the hot path; actor_forward only pads the per-call state.
    """
    S, H1 = params["w1"].shape
    H2 = params["w2"].shape[1]
    A = params["w3"].shape[1]

    sp = _round_up(S, 8)       # layer-1 K only needs sublane (8) alignment
    h1p = _round_up(H1, 128)   # lane-dim padding stays at 128 multiples
    h2p = _round_up(H2, 128)
    ap = _round_up(A, 128)

    return {
        "w1b": _pack_layer(params["w1"], params["b1"], sp, h1p, weight_dtype),
        "w2b": _pack_layer(params["w2"], params["b2"], h1p, h2p, weight_dtype),
        "w3b": _pack_layer(params["w3"], params["b3"], h2p, ap, weight_dtype),
        "dims": (sp, h1p, h2p, ap),
        "state_dim": S,
        "action_dim": A,
    }


# ---------------------------------------------------------------------------
# Kernel
# ---------------------------------------------------------------------------
def _actor_kernel(x_ref, w1_ref, w2_ref, w3_ref, o_ref, *,
                  sp, h1p, h2p, action_range, min_action):
    x = x_ref[...].astype(jnp.bfloat16)

    # Layer 1: Linear + ReLU  (weight rows [0, sp), bias at row sp)
    h1 = jnp.dot(x, w1_ref[:sp, :], preferred_element_type=jnp.float32)
    h1 = jnp.maximum(h1 + w1_ref[sp:sp + 1, :].astype(jnp.float32), 0.0)

    # Layer 2: Linear + ReLU
    h2 = jnp.dot(h1.astype(jnp.bfloat16), w2_ref[:h1p, :],
                 preferred_element_type=jnp.float32)
    h2 = jnp.maximum(h2 + w2_ref[h1p:h1p + 1, :].astype(jnp.float32), 0.0)

    # Layer 3: Linear + Sigmoid (+ rescale)
    z = jnp.dot(h2.astype(jnp.bfloat16), w3_ref[:h2p, :],
                preferred_element_type=jnp.float32)
    z = z + w3_ref[h2p:h2p + 1, :].astype(jnp.float32)
    raw_a = pl.reciprocal(1.0 + jnp.exp(-z), approx=True)   # sigmoid on EUP

    o_ref[...] = raw_a * action_range + min_action


# ---------------------------------------------------------------------------
# Wrapper
# ---------------------------------------------------------------------------
def actor_forward(state, packed, min_action, max_action):
    """Actor MLP forward pass in one Pallas kernel.

    state:  (B, state_dim) array
    packed: output of prepare_actor_params()
    min_action / max_action must be Python scalars (baked into the kernel).
    """
    action_range = float(max_action) - float(min_action)
    min_action = float(min_action)

    state = state.astype(jnp.float32)
    B, S = state.shape
    sp, h1p, h2p, ap = packed["dims"]
    assert S == packed["state_dim"]

    # Batch tiling: one grid step handles BT rows; batch axis is parallel.
    BT = 256 if B > 256 else _round_up(B, 8)
    BP = _round_up(B, BT)
    x_p = _pad_to(state, (BP, sp))

    w1b, w2b, w3b = packed["w1b"], packed["w2b"], packed["w3b"]

    kernel = functools.partial(
        _actor_kernel, sp=sp, h1p=h1p, h2p=h2p,
        action_range=action_range, min_action=min_action)

    out_p = pl.pallas_call(
        kernel,
        out_shape=jax.ShapeDtypeStruct((BP, ap), jnp.float32),
        grid=(BP // BT,),
        in_specs=[
            pl.BlockSpec((BT, sp), lambda i: (i, 0)),
            pl.BlockSpec(w1b.shape, lambda i: (0, 0)),
            pl.BlockSpec(w2b.shape, lambda i: (0, 0)),
            pl.BlockSpec(w3b.shape, lambda i: (0, 0)),
        ],
        out_specs=pl.BlockSpec((BT, ap), lambda i: (i, 0)),
        compiler_params=pltpu.CompilerParams(
            dimension_semantics=("parallel",),
            vmem_limit_bytes=8 << 20,
        ),
    )(x_p, w1b, w2b, w3b)

    return out_p[:B, :packed["action_dim"]]


# ---------------------------------------------------------------------------
# Reference + init
# ---------------------------------------------------------------------------
def init_actor_params(key, state_dim, action_dim):
    """Deterministic synthetic parameter init (weights stored as (in, out))."""
    h1, h2 = 400, 300
    k1, k2, k3, k4, k5, k6 = jax.random.split(key, 6)
    scale = 0.1
    return {
        "w1": scale * jax.random.normal(k1, (state_dim, h1), jnp.float32),
        "b1": scale * jax.random.normal(k2, (h1,), jnp.float32),
        "w2": scale * jax.random.normal(k3, (h1, h2), jnp.float32),
        "b2": scale * jax.random.normal(k4, (h2,), jnp.float32),
        "w3": scale * jax.random.normal(k5, (h2, action_dim), jnp.float32),
        "b3": scale * jax.random.normal(k6, (action_dim,), jnp.float32),
    }


def _reference_forward(state, params, min_action, max_action):
    x = state.astype(jnp.float32)
    h1 = jnp.maximum(x @ params["w1"] + params["b1"], 0.0)
    h2 = jnp.maximum(h1 @ params["w2"] + params["b2"], 0.0)
    raw = jax.nn.sigmoid(h2 @ params["w3"] + params["b3"])
    return raw * (max_action - min_action) + min_action


# ---------------------------------------------------------------------------
# Demo / correctness check
# ---------------------------------------------------------------------------
if __name__ == "__main__":
    # MountainCarContinuous-like dims: state_dim=2, action_dim=1
    state_dim, action_dim = 2, 1
    min_action, max_action = -1.0, 1.0
    batch = 2

    key = jax.random.PRNGKey(0)
    pkey, xkey = jax.random.split(key)
    params = init_actor_params(pkey, state_dim, action_dim)
    packed = prepare_actor_params(params)          # one-time (not in hot path)
    state = jax.random.normal(xkey, (batch, state_dim), jnp.float32)

    out = actor_forward(state, packed, min_action, max_action)
    out = jax.block_until_ready(out)

    ref = _reference_forward(state, params, min_action, max_action)
    assert out.shape == (batch, action_dim)
    # Loose tolerance: kernel uses bf16 weights/activations on the MXU (f32
    # accumulation) and an approximate EUP reciprocal for the sigmoid.
    assert jnp.allclose(out, ref, atol=2e-2, rtol=2e-2), (out, ref)

    print("KERNEL_OK")
</pallas_src>

<mosaic_0001>
module attributes {stable_mosaic.version = 11 : i64} {
  func.func @_actor_kernel(%arg0: i32, %arg1: memref<8x8xf32, #tpu.memory_space<vmem>>, %arg2: memref<16x512xbf16, #tpu.memory_space<vmem>>, %arg3: memref<520x384xbf16, #tpu.memory_space<vmem>>, %arg4: memref<392x128xbf16, #tpu.memory_space<vmem>>, %arg5: memref<8x128xf32, #tpu.memory_space<vmem>>) attributes {dimension_semantics = [#tpu.dimension_semantics<parallel>], iteration_bounds = array<i64: 1>, scalar_prefetch = 0 : i64, scratch_operands = 0 : i64, tpu.core_type = #tpu.core_type<tc>, window_params = [{transform_indices = @transform_0, window_bounds = array<i64: 8, 8>}, {pipeline_mode = #tpu.pipeline_mode<synchronous>, transform_indices = @transform_1, window_bounds = array<i64: 16, 512>}, {pipeline_mode = #tpu.pipeline_mode<synchronous>, transform_indices = @transform_2, window_bounds = array<i64: 520, 384>}, {pipeline_mode = #tpu.pipeline_mode<synchronous>, transform_indices = @transform_3, window_bounds = array<i64: 392, 128>}, {transform_indices = @transform_4, window_bounds = array<i64: 8, 128>}]} {
    %c0 = arith.constant 0 : index
    %c0_0 = arith.constant 0 : index
    %0 = vector.load %arg1[%c0, %c0_0] : memref<8x8xf32, #tpu.memory_space<vmem>>, vector<8x8xf32>
    %1 = arith.truncf %0 : vector<8x8xf32> to vector<8x8xbf16>
    %c0_1 = arith.constant 0 : index
    %c0_2 = arith.constant 0 : index
    %2 = vector.load %arg2[%c0_1, %c0_2] : memref<16x512xbf16, #tpu.memory_space<vmem>>, vector<8x512xbf16>
    %cst = arith.constant dense<0.000000e+00> : vector<8x512xf32>
    %3 = tpu.matmul %1, %2, %cst {dimension_numbers = #tpu.dot_dimension_numbers<[1], [0], [0], [1], [0, 0, 1, 1], [], []>} : vector<8x8xbf16>, vector<8x512xbf16>, vector<8x512xf32> -> vector<8x512xf32>
    %c8 = arith.constant 8 : index
    %c0_3 = arith.constant 0 : index
    %4 = vector.load %arg2[%c8, %c0_3] : memref<16x512xbf16, #tpu.memory_space<vmem>>, vector<1x512xbf16>
    %5 = arith.extf %4 : vector<1x512xbf16> to vector<1x512xf32>
    %6 = vector.broadcast %5 : vector<1x512xf32> to vector<8x512xf32>
    %7 = arith.addf %3, %6 : vector<8x512xf32>
    %cst_4 = arith.constant 0.000000e+00 : f32
    %8 = vector.broadcast %cst_4 : f32 to vector<8x512xf32>
    %9 = arith.maximumf %7, %8 : vector<8x512xf32>
    %10 = arith.truncf %9 : vector<8x512xf32> to vector<8x512xbf16>
    %c0_5 = arith.constant 0 : index
    %c0_6 = arith.constant 0 : index
    %11 = vector.load %arg3[%c0_5, %c0_6] : memref<520x384xbf16, #tpu.memory_space<vmem>>, vector<512x384xbf16>
    %cst_7 = arith.constant dense<0.000000e+00> : vector<8x384xf32>
    %12 = tpu.matmul %10, %11, %cst_7 {dimension_numbers = #tpu.dot_dimension_numbers<[1], [0], [0], [1], [0, 0, 1, 1], [], []>} : vector<8x512xbf16>, vector<512x384xbf16>, vector<8x384xf32> -> vector<8x384xf32>
    %c512 = arith.constant 512 : index
    %c0_8 = arith.constant 0 : index
    %13 = vector.load %arg3[%c512, %c0_8] : memref<520x384xbf16, #tpu.memory_space<vmem>>, vector<1x384xbf16>
    %14 = arith.extf %13 : vector<1x384xbf16> to vector<1x384xf32>
    %15 = vector.broadcast %14 : vector<1x384xf32> to vector<8x384xf32>
    %16 = arith.addf %12, %15 : vector<8x384xf32>
    %cst_9 = arith.constant 0.000000e+00 : f32
    %17 = vector.broadcast %cst_9 : f32 to vector<8x384xf32>
    %18 = arith.maximumf %16, %17 : vector<8x384xf32>
    %19 = arith.truncf %18 : vector<8x384xf32> to vector<8x384xbf16>
    %c0_10 = arith.constant 0 : index
    %c0_11 = arith.constant 0 : index
    %20 = vector.load %arg4[%c0_10, %c0_11] : memref<392x128xbf16, #tpu.memory_space<vmem>>, vector<384x128xbf16>
    %cst_12 = arith.constant dense<0.000000e+00> : vector<8x128xf32>
    %21 = tpu.matmul %19, %20, %cst_12 {dimension_numbers = #tpu.dot_dimension_numbers<[1], [0], [0], [1], [0, 0, 1, 1], [], []>} : vector<8x384xbf16>, vector<384x128xbf16>, vector<8x128xf32> -> vector<8x128xf32>
    %c384 = arith.constant 384 : index
    %c0_13 = arith.constant 0 : index
    %22 = vector.load %arg4[%c384, %c0_13] : memref<392x128xbf16, #tpu.memory_space<vmem>>, vector<1x128xbf16>
    %23 = arith.extf %22 : vector<1x128xbf16> to vector<1x128xf32>
    %24 = vector.broadcast %23 : vector<1x128xf32> to vector<8x128xf32>
    %25 = arith.addf %21, %24 : vector<8x128xf32>
    %cst_14 = arith.constant 0.000000e+00 : f32
    %26 = vector.broadcast %cst_14 : f32 to vector<8x128xf32>
    %27 = arith.subf %26, %25 : vector<8x128xf32>
    %28 = math.exp %27 : vector<8x128xf32>
    %cst_15 = arith.constant 1.000000e+00 : f32
    %29 = vector.broadcast %cst_15 : f32 to vector<8x128xf32>
    %30 = arith.addf %29, %28 : vector<8x128xf32>
    %31 = tpu.reciprocal %30 {approx = true} : vector<8x128xf32> -> vector<8x128xf32>
    %cst_16 = arith.constant 2.000000e+00 : f32
    %32 = vector.broadcast %cst_16 : f32 to vector<8x128xf32>
    %33 = arith.mulf %31, %32 : vector<8x128xf32>
    %cst_17 = arith.constant -1.000000e+00 : f32
    %34 = vector.broadcast %cst_17 : f32 to vector<8x128xf32>
    %35 = arith.addf %33, %34 : vector<8x128xf32>
    %c0_18 = arith.constant 0 : index
    %c0_19 = arith.constant 0 : index
    %36 = vector.load %arg5[%c0_18, %c0_19] : memref<8x128xf32, #tpu.memory_space<vmem>>, vector<8x128xf32>
    tpu.vector_store %arg5[%c0_18, %c0_19], %35 {strides = array<i32>} : memref<8x128xf32, #tpu.memory_space<vmem>>, vector<8x128xf32>,
    return
  }
  func.func @transform_0(%arg0: i32) -> (i32, i32) {
    %c0_i32 = arith.constant 0 : i32
    %c0_i32_0 = arith.constant 0 : i32
    return %arg0, %c0_i32 : i32, i32
  }
  func.func @transform_1(%arg0: i32) -> (i32, i32) {
    %c0_i32 = arith.constant 0 : i32
    %c0_i32_0 = arith.constant 0 : i32
    %c0_i32_1 = arith.constant 0 : i32
    return %c0_i32, %c0_i32_0 : i32, i32
  }
  func.func @transform_2(%arg0: i32) -> (i32, i32) {
    %c0_i32 = arith.constant 0 : i32
    %c0_i32_0 = arith.constant 0 : i32
    %c0_i32_1 = arith.constant 0 : i32
    return %c0_i32, %c0_i32_0 : i32, i32
  }
  func.func @transform_3(%arg0: i32) -> (i32, i32) {
    %c0_i32 = arith.constant 0 : i32
    %c0_i32_0 = arith.constant 0 : i32
    %c0_i32_1 = arith.constant 0 : i32
    return %c0_i32, %c0_i32_0 : i32, i32
  }
  func.func @transform_4(%arg0: i32) -> (i32, i32) {
    %c0_i32 = arith.constant 0 : i32
    %c0_i32_0 = arith.constant 0 : i32
    return %arg0, %c0_i32 : i32, i32
  }
}

</mosaic_0001>

<bundles_post_ra>
// kernel: tpu_custom_call.1
= control target key start
LH: loop header
LB: loop body
LE: loop exit
PB: predicated region body
PF: predicated region fallthrough
CT: control target
= control target key end

     0   :  { %9 = vsyncpa [#allocation3], 0  ;;  %s1920_s0 = inlined_call_operand.hbm [shape: f32[8,8], index: 0, kind: input, shape index: {}]   ;;  %s1921_s1 = inlined_call_operand.hbm [shape: bf16[16,512], index: 1, kind: input, shape index: {}]   ;;  %s1922_s2 = inlined_call_operand.hbm [shape: bf16[520,384], index: 2, kind: input, shape index: {}]   ;;  %s1923_s3 = inlined_call_operand.hbm [shape: bf16[392,128], index: 3, kind: input, shape index: {}]   ;;  %s1924_s4 = inlined_call_operand.hbm [shape: f32[8,128], index: 4, kind: output, shape index: {}]  }
   0x1   :  { %10 = vsyncpa [#allocation6], 0 }
   0x2   :  { %11 = vsyncpa [#allocation9], 0 }
   0x3   :  { %12 = vsyncpa [#allocation4], 0  ;;  %s1848_s15 = smov [#allocation5]  }
   0x4   :  { %s28_s16 = sshll.u32 %s1848_s15, 4  ;;  %s29_s16 = int_to_ptr.vmem [resolvable:$true] %s28_s16 }
   0x5   :  { %s1748_s17 = scalar_lea.vmem %s29_s16, 512  ;;  %p1753_p1 = scmp.lt.s32.totalorder %s29_s16, %s29_s16 }
   0x6   :  { %p1749_p0 = scmp.ne.s32.totalorder %s29_s16, %s1748_s17  ;;  %p1754_p2 = scmp.lt.s32.totalorder %s1748_s17, %s1748_s17 }
   0x8   :  { %p1755_p3 = por %p1754_p2, %p1753_p1 }
   0xa   :  { %p1756_p4 = pnand %p1755_p3, %p1749_p0 }
   0xc   :  { %1759 = shalt.err (!%p1756_p4)
}
   0xd   :  { %s1849_s18 = smov 256   ;;  %s1850_s19 = smov 16  }
   0xe   :  { %34 = dma.hbm_to_vmem [thread:$0]  %s1921_s1, 512, %s29_s16, [#allocation6], %s1849_s18, %s1849_s18, %s1850_s19  }
   0xf   :  { %s1851_s22 = smov [#allocation2]   ;;  %s1852_s24 = smov [#allocation7]  }
  0x10   :  { %s19_s23 = sshll.u32 %s1851_s22, 4  ;;  %s40_s25 = sshll.u32 %s1852_s24, 4  ;;  %s20_s23 = int_to_ptr.vmem [resolvable:$true] %s19_s23  ;;  %s41_s25 = int_to_ptr.vmem [resolvable:$true] %s40_s25 }
  0x11   :  { %s1768_s26 = scalar_lea.vmem %s20_s23, 128  ;;  %p1773_p6 = scmp.lt.s32.totalorder %s20_s23, %s20_s23 }
  0x12   :  { %p1769_p5 = scmp.ne.s32.totalorder %s20_s23, %s1768_s26  ;;  %p1774_p7 = scmp.lt.s32.totalorder %s1768_s26, %s1768_s26 }
  0x14   :  { %p1775_p8 = por %p1774_p7, %p1773_p6 }
  0x16   :  { %p1776_p9 = pnand %p1775_p8, %p1769_p5 }
  0x18   :  { %1779 = shalt.err (!%p1776_p9)
}
  0x19   :  { %22 = dma.hbm_to_vmem [thread:$0]  %s1920_s0, 128, %s20_s23, [#allocation3]  }
  0x1a   :  { %s1788_s29 = scalar_lea.vmem %s41_s25, 12480  ;;  %p1793_p11 = scmp.lt.s32.totalorder %s41_s25, %s41_s25 }
  0x1b   :  { %p1789_p10 = scmp.ne.s32.totalorder %s41_s25, %s1788_s29  ;;  %p1794_p12 = scmp.lt.s32.totalorder %s1788_s29, %s1788_s29 }
  0x1d   :  { %p1795_p13 = por %p1794_p12, %p1793_p11 }
  0x1f   :  { %p1796_p0 = pnand %p1795_p13, %p1789_p10 }
  0x21   :  { %1799 = shalt.err (!%p1796_p0)
}
  0x22   :  { %s1853_s1 = smov 192   ;;  %s1854_s30 = smov 12  }
  0x23   :  { %46 = dma.hbm_to_vmem [thread:$0]  %s1922_s2, 12480, %s41_s25, [#allocation6], %s1853_s1, %s1853_s1, %s1854_s30  }
  0x24   :  { %s1855_s7 = smov [#allocation8]  }
  0x25   :  { %s52_s8 = sshll.u32 %s1855_s7, 4  ;;  %s53_s8 = int_to_ptr.vmem [resolvable:$true] %s52_s8 }
  0x26   :  { %s1808_s9 = scalar_lea.vmem %s53_s8, 3136  ;;  %p1813_p2 = scmp.lt.s32.totalorder %s53_s8, %s53_s8 }
  0x27   :  { %p1809_p1 = scmp.ne.s32.totalorder %s53_s8, %s1808_s9  ;;  %p1814_p3 = scmp.lt.s32.totalorder %s1808_s9, %s1808_s9 }
  0x29   :  { %p1815_p4 = por %p1814_p3, %p1813_p2 }
  0x2b   :  { %p1816_p5 = pnand %p1815_p4, %p1809_p1 }
  0x2d   :  { %1819 = shalt.err (!%p1816_p5)
}
  0x2e   :  { %s1856_s0 = smov 64   ;;  %s1857_s10 = smov 4  }
  0x2f   :  { %58 = dma.hbm_to_vmem [thread:$0]  %s1923_s3, 3136, %s53_s8, [#allocation9], %s1856_s0, %s1856_s0, %s1857_s10  }
  0x30   :  { %1840 = dma.done.wait [#allocation3], 128  }
  0x31   :  { %1841 = vsyncadd [#allocation3], 4294967168 }
  0x32   :  { %1842 = dma.done.wait [#allocation6], 12992  }
  0x33   :  { %1843 = vsyncadd [#allocation6], 4294954304 }
  0x34   :  { %1844 = dma.done.wait [#allocation9], 3136  }
  0x35   :  { %1845 = vsyncadd [#allocation9], 4294964160  ;;  %v1858_v0 = vmov 0   ;;  %v74_v1 = vld [vmem:[#allocation5] sm:$0xff]  ;;  %vm112_vm0 = vcmask 1043456   ;;  %v75_v2 = vld [vmem:[#allocation5 + $0x8] sm:$0xff] }
  0x36   :  { %157 = vmatprep.mubr.bf16.mxu0 %v1858_v0  ;;  %198 = vmatprep.mubr.bf16.mxu1 %v1858_v0  ;;  %v72_v3 = vld [vmem:[#allocation2] sm:$0xff]  ;;  %v1344_v4 = vcombine.high %v74_v1, %v74_v1  ;;  %v1346_v5 = vcombine.high %v75_v2, %v75_v2  ;;  %v1343_v6 = vcombine.low %v74_v1, %v74_v1  ;;  %v1584_v12 = vld [vmem:[#allocation7 + $0xa8] ss:$12 sps:$4 sm:$0xff]   ;;  %vm108_vm1 = vcmask 64512   ;;  %v1604_v23 = vld [vmem:[#allocation7 + $0x64] ss:$12 sps:$4 sm:$0xff]  }
  0x37   :  { %v1345_v7 = vcombine.low %v75_v2, %v75_v2  ;;  %v1586_v8 = vld [vmem:[#allocation7 + $0xac] ss:$12 sps:$4 sm:$0xff]   ;;  %v73_v11 = vpack.c.bf16 %v72_v3, %v72_v3  ;;  %v1587_v14 = vld [vmem:[#allocation7 + $0x228] ss:$12 sps:$4 sm:$0xff]   ;;  %v1590_v17 = vld [vmem:[#allocation7 + $0x90] ss:$12 sps:$4 sm:$0xff]  }
  0x38   :  { %1347 = vmatprep.subr.msk.bf16.mxu0 %vm112_vm0, %v1344_v4  ;;  %1349 = vmatprep.subr.msk.bf16.mxu1 %vm112_vm0, %v1346_v5  ;;  %v114_v9 = vsel %vm112_vm0, %v1343_v6, 0  ;;  %v1589_v13 = vld [vmem:[#allocation7 + $0x22c] ss:$12 sps:$4 sm:$0xff]   ;;  %v1592_v15 = vld [vmem:[#allocation7 + $0x94] ss:$12 sps:$4 sm:$0xff]   ;;  %vm1860_vm2 = vmmov 0  }
  0x39   :  { %v120_v10 = vsel %vm112_vm0, %v1345_v7, 0  ;;  %140 = vmatpush1.bf16.msra.mxu0 %v114_v9  ;;  %v1595_v16 = vld [vmem:[#allocation7 + $0x214] ss:$12 sps:$4 sm:$0xff]   ;;  %v1593_v18 = vld [vmem:[#allocation7 + $0x210] ss:$12 sps:$4 sm:$0xff]   ;;  %s1861_s2 = smov [#allocation10]  }
  0x3a   :  { %181 = vmatpush1.bf16.msra.mxu1 %v120_v10  ;;  %872 = vmatprep.subr.bf16.mxu0 %v1586_v8  ;;  %v1598_v19 = vld [vmem:[#allocation7 + $0x7c] ss:$12 sps:$4 sm:$0xff]   ;;  %v1596_v21 = vld [vmem:[#allocation7 + $0x78] ss:$12 sps:$4 sm:$0xff]   ;;  %v1602_v25 = vld [vmem:[#allocation7 + $0x60] ss:$12 sps:$4 sm:$0xff]  }
  0x3b   :  { %913 = vmatprep.subr.bf16.mxu1 %v1589_v13  ;;  %v1601_v20 = vld [vmem:[#allocation7 + $0x1fc] ss:$12 sps:$4 sm:$0xff]   ;;  %v1599_v22 = vld [vmem:[#allocation7 + $0x1f8] ss:$12 sps:$4 sm:$0xff]   ;;  %v1605_v26 = vld [vmem:[#allocation7 + $0x1e0] ss:$12 sps:$4 sm:$0xff]   ;;  %v82_v13 = vlaneseq }
  0x3c   :  { %1348 = vmatmul.mubr.msk.bf16.vlgmr.msra.gmra.mxu0 %vm108_vm1, %v73_v11  ;;  %v1607_v24 = vld [vmem:[#allocation7 + $0x1e4] ss:$12 sps:$4 sm:$0xff]   ;;  %v1610_v27 = vld [vmem:[#allocation7 + $0x4c] ss:$12 sps:$4 sm:$0xff]   ;;  %v1608_v29 = vld [vmem:[#allocation7 + $0x48] ss:$12 sps:$4 sm:$0xff]  }
  0x3d   :  { %1350 = vmatmul.mubr.msk.bf16.vlgmr.msra.gmra.mxu1 %vm108_vm1, %v73_v11  ;;  %873 = vmatpush1.bf16.msra.mxu0 %v1584_v12  ;;  %v1613_v28 = vld [vmem:[#allocation7 + $0x1cc] ss:$12 sps:$4 sm:$0xff]   ;;  %v1611_v30 = vld [vmem:[#allocation7 + $0x1c8] ss:$12 sps:$4 sm:$0xff]   ;;  %v1614_v33 = vld [vmem:[#allocation7 + $0x30] ss:$12 sps:$4 sm:$0xff]  }
  0x3e   :  { %914 = vmatpush1.bf16.msra.mxu1 %v1587_v14  ;;  %874 = vmatprep.subr.bf16.mxu0 %v1592_v15  ;;  %v1616_v31 = vld [vmem:[#allocation7 + $0x34] ss:$12 sps:$4 sm:$0xff]   ;;  %v1617_v34 = vld [vmem:[#allocation7 + $0x1b0] ss:$12 sps:$4 sm:$0xff]   ;;  %v1620_v37 = vld [vmem:[#allocation7 + $0x18] ss:$12 sps:$4 sm:$0xff]  }
  0x3f   :  { %915 = vmatprep.subr.bf16.mxu1 %v1595_v16  ;;  %v1619_v32 = vld [vmem:[#allocation7 + $0x1b4] ss:$12 sps:$4 sm:$0xff]   ;;  %v1622_v35 = vld [vmem:[#allocation7 + $0x1c] ss:$12 sps:$4 sm:$0xff]   ;;  %v1623_v38 = vld [vmem:[#allocation7 + $0x198] ss:$12 sps:$4 sm:$0xff]  }
  0x40   :  { %v1625_v36 = vld [vmem:[#allocation7 + $0x19c] ss:$12 sps:$4 sm:$0xff]   ;;  %v1628_v39 = vld [vmem:[#allocation7 + $0x4] ss:$12 sps:$4 sm:$0xff]   ;;  %v1626_v41 = vld [vmem:[#allocation7] ss:$12 sps:$4 sm:$0xff]  }
  0x41   :  { %875 = vmatpush1.bf16.msra.mxu0 %v1590_v17  ;;  %v1631_v40 = vld [vmem:[#allocation7 + $0x184] ss:$12 sps:$4 sm:$0xff]   ;;  %v1629_v42 = vld [vmem:[#allocation7 + $0x180] ss:$12 sps:$4 sm:$0xff]   ;;  %v1632_v45 = vld [vmem:[#allocation7 + $0x168] ss:$12 sps:$4 sm:$0xff]  }
  0x42   :  { %916 = vmatpush1.bf16.msra.mxu1 %v1593_v18  ;;  %876 = vmatprep.subr.bf16.mxu0 %v1598_v19  ;;  %v1634_v43 = vld [vmem:[#allocation7 + $0x16c] ss:$12 sps:$4 sm:$0xff]   ;;  %v1635_v46 = vld [vmem:[#allocation7 + $0x2e8] ss:$12 sps:$4 sm:$0xff]   ;;  %v1638_v49 = vld [vmem:[#allocation7 + $0x150] ss:$12 sps:$4 sm:$0xff]  }
  0x43   :  { %917 = vmatprep.subr.bf16.mxu1 %v1601_v20  ;;  %v1637_v44 = vld [vmem:[#allocation7 + $0x2ec] ss:$12 sps:$4 sm:$0xff]   ;;  %v1640_v47 = vld [vmem:[#allocation7 + $0x154] ss:$12 sps:$4 sm:$0xff]   ;;  %v1641_v50 = vld [vmem:[#allocation7 + $0x2d0] ss:$12 sps:$4 sm:$0xff]  }
  0x44   :  { %v1643_v48 = vld [vmem:[#allocation7 + $0x2d4] ss:$12 sps:$4 sm:$0xff]   ;;  %v1646_v51 = vld [vmem:[#allocation7 + $0x13c] ss:$12 sps:$4 sm:$0xff]   ;;  %v1644_v53 = vld [vmem:[#allocation7 + $0x138] ss:$12 sps:$4 sm:$0xff]  }
  0x45   :  { %877 = vmatpush1.bf16.msra.mxu0 %v1596_v21  ;;  %v1649_v52 = vld [vmem:[#allocation7 + $0x2bc] ss:$12 sps:$4 sm:$0xff]   ;;  %v1647_v54 = vld [vmem:[#allocation7 + $0x2b8] ss:$12 sps:$4 sm:$0xff]   ;;  %v1650_v57 = vld [vmem:[#allocation7 + $0x120] ss:$12 sps:$4 sm:$0xff]  }
  0x46   :  { %918 = vmatpush1.bf16.msra.mxu1 %v1599_v22  ;;  %878 = vmatprep.subr.bf16.mxu0 %v1604_v23  ;;  %v1652_v55 = vld [vmem:[#allocation7 + $0x124] ss:$12 sps:$4 sm:$0xff]   ;;  %v1653_v58 = vld [vmem:[#allocation7 + $0x2a0] ss:$12 sps:$4 sm:$0xff]   ;;  %v1656_v61 = vld [vmem:[#allocation7 + $0x108] ss:$12 sps:$4 sm:$0xff]  }
  0x47   :  { %919 = vmatprep.subr.bf16.mxu1 %v1607_v24  ;;  %v1655_v56 = vld [vmem:[#allocation7 + $0x2a4] ss:$12 sps:$4 sm:$0xff]   ;;  %v1658_v59 = vld [vmem:[#allocation7 + $0x10c] ss:$12 sps:$4 sm:$0xff]   ;;  %v1659_v62 = vld [vmem:[#allocation7 + $0x288] ss:$12 sps:$4 sm:$0xff]  }
  0x48   :  { %v1661_v60 = vld [vmem:[#allocation7 + $0x28c] ss:$12 sps:$4 sm:$0xff]   ;;  %v1664_v63 = vld [vmem:[#allocation7 + $0xf4] ss:$12 sps:$4 sm:$0xff]   ;;  %v1662_v1 = vld [vmem:[#allocation7 + $0xf0] ss:$12 sps:$4 sm:$0xff]  }
  0x49   :  { %879 = vmatpush1.bf16.msra.mxu0 %v1602_v25  ;;  %v1667_v0 = vld [vmem:[#allocation7 + $0x274] ss:$12 sps:$4 sm:$0xff]   ;;  %v1665_v2 = vld [vmem:[#allocation7 + $0x270] ss:$12 sps:$4 sm:$0xff]   ;;  %v1668_v5 = vld [vmem:[#allocation7 + $0xd8] ss:$12 sps:$4 sm:$0xff]  }
  0x4a   :  { %920 = vmatpush1.bf16.msra.mxu1 %v1605_v26  ;;  %880 = vmatprep.subr.bf16.mxu0 %v1610_v27  ;;  %v1670_v3 = vld [vmem:[#allocation7 + $0xdc] ss:$12 sps:$4 sm:$0xff]   ;;  %v1671_v6 = vld [vmem:[#allocation7 + $0x258] ss:$12 sps:$4 sm:$0xff]   ;;  %v1674_v9 = vld [vmem:[#allocation7 + $0xc0] ss:$12 sps:$4 sm:$0xff]  }
  0x4b   :  { %921 = vmatprep.subr.bf16.mxu1 %v1613_v28  ;;  %v1673_v4 = vld [vmem:[#allocation7 + $0x25c] ss:$12 sps:$4 sm:$0xff]   ;;  %v1676_v7 = vld [vmem:[#allocation7 + $0xc4] ss:$12 sps:$4 sm:$0xff]   ;;  %v1677_v10 = vld [vmem:[#allocation7 + $0x240] ss:$12 sps:$4 sm:$0xff]  }
  0x4c   :  { %v1679_v8 = vld [vmem:[#allocation7 + $0x244] ss:$12 sps:$4 sm:$0xff]   ;;  %v83_v14 = vshrl.u32 %v82_v13, 7  ;;  %v77_v16 = vld [vmem:[#allocation5 + $0x18] sm:$0x11]  ;;  %s1332_s3 = sshll.u32 %s1861_s2, 4  ;;  %s1333_s3 = int_to_ptr.vmem [resolvable:$true] %s1332_s3 }
  0x4d   :  { %881 = vmatpush1.bf16.msra.mxu0 %v1608_v29  ;;  %v1680_v11 = vld [vmem:[#allocation7 + $0x170] ss:$12 sps:$4 sm:$0xff]   ;;  %v80_v19 = vunpack.c.l.bf16 %v77_v16  ;;  %v81_v21 = vunpack.c.h.bf16 %v77_v16  ;;  %v1713_v13 = vld [vmem:[#allocation8 + $0x38] sm:$0xff]   ;;  %v1716_v16 = vld [vmem:[#allocation8 + $0x68] sm:$0xff]   ;;  %s1820_s13 = scalar_lea.vmem %s1333_s3, 128  ;;  %p1825_p7 = scmp.lt.s32.totalorder %s1333_s3, %s1333_s3 }
  0x4e   :  { %922 = vmatpush1.bf16.msra.mxu1 %v1611_v30  ;;  %882 = vmatprep.subr.bf16.mxu0 %v1616_v31  ;;  %v1681_v12 = vld [vmem:[#allocation7 + $0x2f0] ss:$12 sps:$4 sm:$0xff]   ;;  %v1899_v18 = vsub.s32 0, %v83_v14  ;;  %p1821_p6 = scmp.ne.s32.totalorder %s1333_s3, %s1820_s13  ;;  %p1826_p8 = scmp.lt.s32.totalorder %s1820_s13, %s1820_s13 }
  0x4f   :  { %923 = vmatprep.subr.bf16.mxu1 %v1619_v32  ;;  %v76_v15 = vld [vmem:[#allocation5 + $0x10] sm:$0x11]  ;;  %v1714_v14 = vld [vmem:[#allocation8 + $0x70] sm:$0xff]  }
  0x50   :  { %v78_v17 = vunpack.c.l.bf16 %v76_v15  ;;  %v79_v20 = vunpack.c.h.bf16 %v76_v15  ;;  %v93_v23 = vrot.slane %v80_v19, %v1899_v18  ;;  %v97_v25 = vrot.slane %v81_v21, %v1899_v18  ;;  %v1715_v15 = vld [vmem:[#allocation8 + $0x30] sm:$0xff]   ;;  %v1718_v19 = vld [vmem:[#allocation8 + $0x60] sm:$0xff]   ;;  %v1720_v21 = vld [vmem:[#allocation8 + $0x58] sm:$0xff]   ;;  %p1827_p9 = por %p1826_p8, %p1825_p7 }
  0x51   :  { %883 = vmatpush1.bf16.msra.mxu0 %v1614_v33 }
  0x52   :  { %924 = vmatpush1.bf16.msra.mxu1 %v1617_v34  ;;  %884 = vmatprep.subr.bf16.mxu0 %v1622_v35  ;;  %v85_v22 = vrot.slane %v78_v17, %v1899_v18  ;;  %v89_v24 = vrot.slane %v79_v20, %v1899_v18  ;;  %v1717_v17 = vld [vmem:[#allocation8 + $0x28] sm:$0xff]   ;;  %v1719_v20 = vld [vmem:[#allocation8 + $0x20] sm:$0xff]   ;;  %p1828_p10 = pnand %p1827_p9, %p1821_p6 }
  0x53   :  { %925 = vmatprep.subr.bf16.mxu1 %v1625_v36 }
  0x55   :  { %885 = vmatpush1.bf16.msra.mxu0 %v1620_v37 }
  0x56   :  { %926 = vmatpush1.bf16.msra.mxu1 %v1623_v38  ;;  %886 = vmatprep.subr.bf16.mxu0 %v1628_v39 }
  0x57   :  { %927 = vmatprep.subr.bf16.mxu1 %v1631_v40 }
  0x59   :  { %887 = vmatpush1.bf16.msra.mxu0 %v1626_v41 }
  0x5a   :  { %928 = vmatpush1.bf16.msra.mxu1 %v1629_v42  ;;  %888 = vmatprep.subr.bf16.mxu0 %v1634_v43 }
  0x5b   :  { %929 = vmatprep.subr.bf16.mxu1 %v1637_v44 }
  0x5d   :  { %889 = vmatpush2.bf16.msra.mxu0 %v1632_v45  ;;  %v1682_v45 = vld [vmem:[#allocation7 + $0xb0] ss:$12 sps:$4 sm:$0xff]  }
  0x5e   :  { %930 = vmatpush2.bf16.msra.mxu1 %v1635_v46  ;;  %890 = vmatprep.subr.bf16.mxu0 %v1640_v47  ;;  %v1683_v46 = vld [vmem:[#allocation7 + $0x230] ss:$12 sps:$4 sm:$0xff]  }
  0x5f   :  { %931 = vmatprep.subr.bf16.mxu1 %v1643_v48  ;;  %v1684_v48 = vld [vmem:[#allocation7 + $0x158] ss:$12 sps:$4 sm:$0xff]  }
  0x61   :  { %891 = vmatpush2.bf16.msra.mxu0 %v1638_v49  ;;  %v1685_v49 = vld [vmem:[#allocation7 + $0x2d8] ss:$12 sps:$4 sm:$0xff]  }
  0x62   :  { %932 = vmatpush2.bf16.msra.mxu1 %v1641_v50  ;;  %892 = vmatprep.subr.bf16.mxu0 %v1646_v51  ;;  %v1686_v50 = vld [vmem:[#allocation7 + $0x98] ss:$12 sps:$4 sm:$0xff]  }
  0x63   :  { %933 = vmatprep.subr.bf16.mxu1 %v1649_v52  ;;  %v1687_v51 = vld [vmem:[#allocation7 + $0x218] ss:$12 sps:$4 sm:$0xff]   ;;  %v1688_v52 = vld [vmem:[#allocation7 + $0x140] ss:$12 sps:$4 sm:$0xff]  }
  0x65   :  { %893 = vmatpush2.bf16.msra.mxu0 %v1644_v53  ;;  %v1689_v53 = vld [vmem:[#allocation7 + $0x2c0] ss:$12 sps:$4 sm:$0xff]  }
  0x66   :  { %934 = vmatpush2.bf16.msra.mxu1 %v1647_v54  ;;  %894 = vmatprep.subr.bf16.mxu0 %v1652_v55  ;;  %v1690_v54 = vld [vmem:[#allocation7 + $0x80] ss:$12 sps:$4 sm:$0xff]  }
  0x67   :  { %935 = vmatprep.subr.bf16.mxu1 %v1655_v56  ;;  %v1691_v55 = vld [vmem:[#allocation7 + $0x200] ss:$12 sps:$4 sm:$0xff]   ;;  %v1692_v56 = vld [vmem:[#allocation7 + $0x128] ss:$12 sps:$4 sm:$0xff]  }
  0x69   :  { %895 = vmatpush2.bf16.msra.mxu0 %v1650_v57  ;;  %v1693_v57 = vld [vmem:[#allocation7 + $0x2a8] ss:$12 sps:$4 sm:$0xff]  }
  0x6a   :  { %936 = vmatpush2.bf16.msra.mxu1 %v1653_v58  ;;  %896 = vmatprep.subr.bf16.mxu0 %v1658_v59  ;;  %v1694_v58 = vld [vmem:[#allocation7 + $0x68] ss:$12 sps:$4 sm:$0xff]  }
  0x6b   :  { %937 = vmatprep.subr.bf16.mxu1 %v1661_v60  ;;  %v1695_v59 = vld [vmem:[#allocation7 + $0x1e8] ss:$12 sps:$4 sm:$0xff]   ;;  %v1696_v60 = vld [vmem:[#allocation7 + $0x110] ss:$12 sps:$4 sm:$0xff]  }
  0x6d   :  { %897 = vmatpush2.bf16.msra.mxu0 %v1656_v61  ;;  %v1697_v61 = vld [vmem:[#allocation7 + $0x290] ss:$12 sps:$4 sm:$0xff]  }
  0x6e   :  { %938 = vmatpush2.bf16.msra.mxu1 %v1659_v62  ;;  %898 = vmatprep.subr.bf16.mxu0 %v1664_v63  ;;  %v1698_v62 = vld [vmem:[#allocation7 + $0x50] ss:$12 sps:$4 sm:$0xff]  }
  0x6f   :  { %939 = vmatprep.subr.bf16.mxu1 %v1667_v0  ;;  %v1699_v63 = vld [vmem:[#allocation7 + $0x1d0] ss:$12 sps:$4 sm:$0xff]   ;;  %v1700_v0 = vld [vmem:[#allocation7 + $0xf8] ss:$12 sps:$4 sm:$0xff]  }
  0x71   :  { %899 = vmatpush2.bf16.msra.mxu0 %v1662_v1  ;;  %v1701_v1 = vld [vmem:[#allocation7 + $0x278] ss:$12 sps:$4 sm:$0xff]  }
  0x72   :  { %940 = vmatpush2.bf16.msra.mxu1 %v1665_v2  ;;  %900 = vmatprep.subr.bf16.mxu0 %v1670_v3  ;;  %v1702_v2 = vld [vmem:[#allocation7 + $0x38] ss:$12 sps:$4 sm:$0xff]  }
  0x73   :  { %941 = vmatprep.subr.bf16.mxu1 %v1673_v4  ;;  %v1703_v3 = vld [vmem:[#allocation7 + $0x1b8] ss:$12 sps:$4 sm:$0xff]   ;;  %v1704_v4 = vld [vmem:[#allocation7 + $0xe0] ss:$12 sps:$4 sm:$0xff]  }
  0x75   :  { %901 = vmatpush2.bf16.msra.mxu0 %v1668_v5  ;;  %v1705_v5 = vld [vmem:[#allocation7 + $0x260] ss:$12 sps:$4 sm:$0xff]  }
  0x76   :  { %942 = vmatpush2.bf16.msra.mxu1 %v1671_v6  ;;  %902 = vmatprep.subr.bf16.mxu0 %v1676_v7  ;;  %v1706_v6 = vld [vmem:[#allocation7 + $0x20] ss:$12 sps:$4 sm:$0xff]  }
  0x77   :  { %943 = vmatprep.subr.bf16.mxu1 %v1679_v8  ;;  %v1707_v7 = vld [vmem:[#allocation7 + $0x1a0] ss:$12 sps:$4 sm:$0xff]   ;;  %v1708_v8 = vld [vmem:[#allocation7 + $0xc8] ss:$12 sps:$4 sm:$0xff]  }
  0x79   :  { %903 = vmatpush2.bf16.msra.mxu0 %v1674_v9  ;;  %v1709_v9 = vld [vmem:[#allocation7 + $0x248] ss:$12 sps:$4 sm:$0xff]  }
  0x7a   :  { %944 = vmatpush2.bf16.msra.mxu1 %v1677_v10  ;;  %1471 = vmatprep.subr.bf16.mxu0 %v1680_v11  ;;  %v1710_v10 = vld [vmem:[#allocation7 + $0x8] ss:$12 sps:$4 sm:$0xff]  }
  0x7b   :  { %1493 = vmatprep.subr.bf16.mxu1 %v1681_v12  ;;  %v1711_v11 = vld [vmem:[#allocation7 + $0x188] ss:$12 sps:$4 sm:$0xff]  }
  0x7c   :  { %v1712_v12 = vld [vmem:[#allocation8 + $0x78] sm:$0xff]  }
  0xfc   :  { %v159_v26 = vpop.f32.mrf.mxu0 }
  0xfd   :  { %v200_v27 = vpop.f32.mrf.mxu1  ;;  %v160_v28 = vadd.f32 %v159_v26, %v85_v22  ;;  %v1721_v22 = vld [vmem:[#allocation8 + $0x18] sm:$0xff]   ;;  %v1725_v26 = vld [vmem:[#allocation8 + $0x8] sm:$0xff]  }
  0xfe   :  { %v201_v29 = vadd.f32 %v200_v27, %v93_v23  ;;  %v161_v30 = vpop.f32.mrf.mxu0  ;;  %v1722_v23 = vld [vmem:[#allocation8 + $0x50] sm:$0xff]   ;;  %v1726_v27 = vld [vmem:[#allocation8 + $0x40] sm:$0xff]  }
  0xff   :  { %v202_v31 = vpop.f32.mrf.mxu1  ;;  %v162_v33 = vadd.f32 %v161_v30, %v89_v24  ;;  %v207_v35 = vmax.f32 %v160_v28, 0.0  ;;  %v1723_v24 = vld [vmem:[#allocation8 + $0x10] sm:$0xff]   ;;  %v1727_v28 = vld [vmem:[#allocation8] sm:$0xff]   ;;  %v1859_v30 = vmov 0.0  }
 0x100   :  { %v209_v32 = vmax.f32 %v201_v29, 0.0  ;;  %v203_v34 = vadd.f32 %v202_v31, %v97_v25  ;;  %v163_v36 = vpop.f32.mrf.mxu0  ;;  %v1724_v25 = vld [vmem:[#allocation8 + $0x48] sm:$0xff]   ;;  %v1728_v29 = vld [vmem:[#allocation8 + $0xb8] sm:$0xff]   ;;  %v1729_v31 = vld [vmem:[#allocation8 + $0xb0] sm:$0xff]  }
 0x101   :  { %v204_v37 = vpop.f32.mrf.mxu1  ;;  %v208_v38 = vmax.f32 %v162_v33, 0.0  ;;  %v1907_v47 = vpack.c.bf16 %v207_v35, %v207_v35  ;;  %v1731_v33 = vld [vmem:[#allocation8 + $0xa0] sm:$0xff]   ;;  %v1733_v35 = vld [vmem:[#allocation8 + $0x90] sm:$0xff]   ;;  %v1734_v36 = vld [vmem:[#allocation8 + $0x88] sm:$0xff]  }
 0x102   :  { %v210_v39 = vmax.f32 %v203_v34, 0.0  ;;  %v1905_v40 = vpack.c.bf16 %v209_v32, %v209_v32  ;;  %v164_v41 = vpop.f32.mrf.mxu0  ;;  %v1730_v32 = vld [vmem:[#allocation8 + $0xa8] sm:$0xff]   ;;  %v1732_v34 = vld [vmem:[#allocation8 + $0x98] sm:$0xff]   ;;  %v1735_v37 = vld [vmem:[#allocation8 + $0x80] sm:$0xff]  }
 0x103   :  { %v205_v42 = vpop.f32.mrf.mxu1  ;;  %v212_v43 = vpack.c.bf16 %v208_v38, %v208_v38  ;;  %v343_v38 = vld [vmem:[#allocation7 + $0x300] sm:$0x11] }
 0x104   :  { %v214_v44 = vpack.c.bf16 %v210_v39, %v210_v39  ;;  %v345_v39 = vunpack.c.l.bf16 %v343_v38 }
 0x105   :  { %904 = vmatprep.mubr.bf16.mxu0 %v212_v43 }
 0x106   :  { %945 = vmatprep.mubr.bf16.mxu1 %v214_v44  ;;  %905 = vmatmul.mubr.bf16.vlgmr.msra.gmra.mxu0 %v1907_v47  ;;  %v351_v41 = vrot.slane %v345_v39, %v1899_v18 }
 0x107   :  { %946 = vmatmul.mubr.bf16.vlgmr.msra.gmra.mxu1 %v1905_v40  ;;  %1472 = vmatpush3.bf16.msra.mxu0 %v1682_v45 }
 0x108   :  { %1494 = vmatpush3.bf16.msra.mxu1 %v1683_v46  ;;  %986 = vmatprep.mubr.bf16.mxu0 %v212_v43 }
 0x109   :  { %1026 = vmatprep.mubr.bf16.mxu1 %v214_v44  ;;  %1473 = vmatprep.subr.bf16.mxu0 %v1684_v48 }
 0x10a   :  { %1495 = vmatprep.subr.bf16.mxu1 %v1685_v49 }
 0x10b   :  { %1474 = vmatpush3.bf16.msra.mxu0 %v1686_v50 }
 0x10c   :  { %1496 = vmatpush3.bf16.msra.mxu1 %v1687_v51  ;;  %1475 = vmatprep.subr.bf16.mxu0 %v1688_v52 }
 0x10d   :  { %1497 = vmatprep.subr.bf16.mxu1 %v1689_v53 }
 0x10f   :  { %1476 = vmatpush3.bf16.msra.mxu0 %v1690_v54 }
 0x110   :  { %1498 = vmatpush3.bf16.msra.mxu1 %v1691_v55  ;;  %1477 = vmatprep.subr.bf16.mxu0 %v1692_v56 }
 0x111   :  { %1499 = vmatprep.subr.bf16.mxu1 %v1693_v57 }
 0x113   :  { %1478 = vmatpush3.bf16.msra.mxu0 %v1694_v58 }
 0x114   :  { %1500 = vmatpush3.bf16.msra.mxu1 %v1695_v59  ;;  %1479 = vmatprep.subr.bf16.mxu0 %v1696_v60  ;;  %v344_v59 = vld [vmem:[#allocation7 + $0x308] sm:$0x1] }
 0x115   :  { %1501 = vmatprep.subr.bf16.mxu1 %v1697_v61  ;;  %v347_v60 = vunpack.c.l.bf16 %v344_v59 }
 0x117   :  { %1480 = vmatpush3.bf16.msra.mxu0 %v1698_v62 }
 0x118   :  { %1502 = vmatpush3.bf16.msra.mxu1 %v1699_v63  ;;  %1481 = vmatprep.subr.bf16.mxu0 %v1700_v0  ;;  %v359_v63 = vrot.slane %v347_v60, %v1899_v18 }
 0x119   :  { %1503 = vmatprep.subr.bf16.mxu1 %v1701_v1 }
 0x11b   :  { %1482 = vmatpush3.bf16.msra.mxu0 %v1702_v2 }
 0x11c   :  { %1504 = vmatpush3.bf16.msra.mxu1 %v1703_v3  ;;  %1483 = vmatprep.subr.bf16.mxu0 %v1704_v4 }
 0x11d   :  { %1505 = vmatprep.subr.bf16.mxu1 %v1705_v5 }
 0x11f   :  { %1484 = vmatpush3.bf16.msra.mxu0 %v1706_v6 }
 0x120   :  { %1506 = vmatpush3.bf16.msra.mxu1 %v1707_v7  ;;  %1485 = vmatprep.subr.bf16.mxu0 %v1708_v8 }
 0x121   :  { %1507 = vmatprep.subr.bf16.mxu1 %v1709_v9 }
 0x123   :  { %1486 = vmatpush3.bf16.msra.mxu0 %v1710_v10 }
 0x124   :  { %1508 = vmatpush3.bf16.msra.mxu1 %v1711_v11  ;;  %1515 = vmatprep.subr.bf16.mxu0 %v1712_v12 }
 0x125   :  { %1546 = vmatprep.subr.bf16.mxu1 %v1859_v30 }
 0x126   :  { %987 = vmatmul.mubr.bf16.vlgmr.msra.gmra.mxu0 %v1907_v47 }
 0x127   :  { %1027 = vmatmul.mubr.bf16.vlgmr.msra.gmra.mxu1 %v1905_v40  ;;  %1516 = vmatpush3.bf16.msra.mxu0 %v1713_v13  ;;  %v346_v40 = vunpack.c.h.bf16 %v343_v38 }
 0x128   :  { %1517 = vmatprep.subr.bf16.mxu0 %v1714_v14  ;;  %1547 = vmatpush3.bf16.msra.mxu1 %v1728_v29 }
 0x129   :  { %1548 = vmatprep.subr.bf16.mxu1 %v1859_v30  ;;  %1562 = vmatprep.mubr.msk.bf16.mxu1 %vm1860_vm2, %v1859_v30  ;;  %v355_v42 = vrot.slane %v346_v40, %v1899_v18 }
 0x12b   :  { %1518 = vmatpush3.bf16.msra.mxu0 %v1715_v15 }
 0x12c   :  { %1519 = vmatprep.subr.bf16.mxu0 %v1716_v16  ;;  %1549 = vmatpush3.bf16.msra.mxu1 %v1729_v31  ;;  %v1088_v16 = vld [vmem:[#allocation8 + $0xc0] sm:$0x1] }
 0x12d   :  { %1550 = vmatprep.subr.bf16.mxu1 %v1859_v30 }
 0x12f   :  { %1520 = vmatpush3.bf16.msra.mxu0 %v1717_v17  ;;  %v1089_v17 = vunpack.c.l.bf16 %v1088_v16 }
 0x130   :  { %1521 = vmatprep.subr.bf16.mxu0 %v1718_v19  ;;  %1551 = vmatpush3.bf16.msra.mxu1 %v1730_v32 }
 0x131   :  { %1552 = vmatprep.subr.bf16.mxu1 %v1859_v30 }
 0x133   :  { %1522 = vmatpush3.bf16.msra.mxu0 %v1719_v20  ;;  %v1093_v20 = vrot.slane %v1089_v17, %v1899_v18 }
 0x134   :  { %1523 = vmatprep.subr.bf16.mxu0 %v1720_v21  ;;  %1553 = vmatpush3.bf16.msra.mxu1 %v1731_v33 }
 0x135   :  { %1554 = vmatprep.subr.bf16.mxu1 %v1859_v30 }
 0x137   :  { %1524 = vmatpush3.bf16.msra.mxu0 %v1721_v22 }
 0x138   :  { %1525 = vmatprep.subr.bf16.mxu0 %v1722_v23  ;;  %1555 = vmatpush3.bf16.msra.mxu1 %v1732_v34 }
 0x139   :  { %1556 = vmatprep.subr.bf16.mxu1 %v1859_v30 }
 0x13b   :  { %1526 = vmatpush3.bf16.msra.mxu0 %v1723_v24 }
 0x13c   :  { %1527 = vmatprep.subr.bf16.mxu0 %v1724_v25  ;;  %1557 = vmatpush3.bf16.msra.mxu1 %v1733_v35 }
 0x13d   :  { %1558 = vmatprep.subr.bf16.mxu1 %v1859_v30 }
 0x13f   :  { %1528 = vmatpush3.bf16.msra.mxu0 %v1725_v26 }
 0x140   :  { %1529 = vmatprep.subr.bf16.mxu0 %v1726_v27  ;;  %1559 = vmatpush3.bf16.msra.mxu1 %v1734_v36 }
 0x141   :  { %1560 = vmatprep.subr.bf16.mxu1 %v1859_v30 }
 0x143   :  { %1530 = vmatpush3.bf16.msra.mxu0 %v1727_v28 }
 0x144   :  { %1561 = vmatpush3.bf16.msra.mxu1 %v1735_v37 }
 0x1c6   :  { %v906_v43 = vpop.f32.mrf.mxu0 }
 0x1c7   :  { %v947_v44 = vpop.f32.mrf.mxu1  ;;  %v907_v45 = vadd.f32 %v906_v43, %v351_v41 }
 0x1c8   :  { %v908_v46 = vpop.f32.mrf.mxu0 }
 0x1c9   :  { %v949_v47 = vpop.f32.mrf.mxu1  ;;  %v948_v48 = vadd.f32 %v947_v44, %v907_v45  ;;  %v909_v49 = vadd.f32 %v908_v46, %v355_v42 }
 0x1ca   :  { %v910_v50 = vpop.f32.mrf.mxu0 }
 0x1cb   :  { %v951_v51 = vpop.f32.mrf.mxu1  ;;  %v950_v52 = vadd.f32 %v949_v47, %v909_v49  ;;  %v1034_v53 = vmax.f32 %v948_v48, 0.0 }
 0x1cc   :  { %v911_v54 = vpop.f32.mrf.mxu0 }
 0x1cd   :  { %v952_v55 = vpop.f32.mrf.mxu1  ;;  %v1035_v56 = vmax.f32 %v950_v52, 0.0  ;;  %v1037_v58 = vpack.c.bf16 %v1034_v53, %v1034_v53 }
 0x1cf   :  { %v1038_v57 = vpack.c.bf16 %v1035_v56, %v1035_v56 }
 0x1d1   :  { %1270 = vmatprep.mubr.bf16.mxu0 %v1038_v57 }
 0x1d2   :  { %1271 = vmatmul.mubr.bf16.vlgmr.msra.gmra.mxu0 %v1037_v58 }
 0x1e6   :  { %v1487_v61 = vpop.f32.mrf.mxu0 }
 0x1e7   :  { %v1509_v62 = vpop.f32.mrf.mxu1 }
 0x1e8   :  { %v1488_v0 = vpop.f32.mrf.mxu0 }
 0x1e9   :  { %v1510_v1 = vpop.f32.mrf.mxu1  ;;  %v1489_v2 = vadd.f32 %v1488_v0, %v1487_v61 }
 0x1ea   :  { %v1490_v3 = vpop.f32.mrf.mxu0  ;;  %v1511_v6 = vadd.f32 %v1510_v1, %v1509_v62 }
 0x1eb   :  { %v1512_v4 = vpop.f32.mrf.mxu1  ;;  %v989_v5 = vadd.f32 %v1489_v2, %v359_v63 }
 0x1ec   :  { %v1491_v7 = vpop.f32.mrf.mxu0 }
 0x1ed   :  { %v1513_v8 = vpop.f32.mrf.mxu1  ;;  %v1029_v9 = vadd.f32 %v1511_v6, %v989_v5 }
 0x1ef   :  { %v1036_v10 = vmax.f32 %v1029_v9, 0.0 }
 0x1f1   :  { %v1039_v11 = vpack.c.bf16 %v1036_v10, %v1036_v10 }
 0x1f3   :  { %1563 = vmatmul.mubr.bf16.vlgmr.msra.gmra.mxu1 %v1039_v11 }
 0x292   :  { %v1531_v12 = vpop.f32.mrf.mxu0 }
 0x294   :  { %v1532_v13 = vpop.f32.mrf.mxu0 }
 0x295   :  { %v1533_v19 = vadd.f32 %v1532_v13, %v1531_v12 }
 0x296   :  { %v1534_v14 = vpop.f32.mrf.mxu0 }
 0x297   :  { %v1273_v21 = vadd.f32 %v1533_v19, %v1093_v20 }
 0x298   :  { %v1535_v15 = vpop.f32.mrf.mxu0 }
 0x2b3   :  { %v1312_v22 = vpop.f32.mrf.mxu1 }
 0x2b4   :  { %v1313_v23 = vadd.f32 %v1312_v22, %v1273_v21 }
 0x2b5   :  { %v1564_v24 = vpop.f32.mrf.mxu1 }
 0x2b6   :  { %v1318_v25 = vsub.f32 0.0, %v1313_v23 }
 0x2b7   :  { %v1315_v26 = vpop.f32.mrf.mxu1 }
 0x2b8   :  { %v1319_v27 = vmul.f32 1.442695, %v1318_v25 }
 0x2b9   :  { %v1565_v28 = vpop.f32.mrf.mxu1 }
 0x2ba   :  { %1736 = vpow2.f32 %v1319_v27 }
 0x2c7   :  { %v1737_v29 = vpop.eup %1736 }
 0x2c8   :  { %v1321_v30 = vadd.f32 1.0, %v1737_v29 }
 0x2ca   :  { %1738 = vrcp.f32 %v1321_v30 }
 0x2d7   :  { %v1739_v31 = vpop.eup %1738 }
 0x2d8   :  { %v1323_v32 = vmul.f32 2.0, %v1739_v31 }
 0x2da   :  { %v1324_v33 = vadd.f32 -1.0, %v1323_v32 }
 0x2dc   :  { %1325 = vst [vmem:[#allocation10] sm:$0xff] %v1324_v33 }
 0x2dd   :  { %1831 = shalt.err (!%p1828_p10)
}
 0x2de   :  { %1335 = dma.vmem_to_hbm [thread:$0]  %s1333_s3, 128, %s1924_s4, [#allocation4]  }
 0x2df   :  { %1846 = dma.done.wait [#allocation4], 128  }
 0x2e0   :  { %1847 = vsyncadd [#allocation4], 4294967168 }
 0x2e1   :  { %1339 = vsyncpa [#allocation3], 1 }
 0x2e2   :  { %1340 = vsyncpa [#allocation6], 1 }
 0x2e3   :  { %1341 = vsyncpa [#allocation9], 1 }
 0x2e4   :  { %1342 = vsyncpa [#allocation4], 1 }

</bundles_post_ra>
